<compile_context>
chip_gen: v7x
topology: tpu7x:2x2x1
jax: 0.10.0
libtpu: 0.0.40
codegen_flags: <defaults>
</compile_context>

<pallas_src>
import jax
import jax.numpy as jnp
from jax.experimental import pallas as pl
from jax.experimental.pallas import tpu as pltpu

_MIB = 1024 * 1024


# ---------------------------------------------------------------------------
# Kernel (works for both 2-D (rows, H) and 3-D (TB, TS, H) tiles)
# ---------------------------------------------------------------------------
def _add_pe_kernel(x_ref, pe_ref, o_ref):
    # x_ref : (TS, H) or (TB, TS, H) tile of hidden_states
    # pe_ref: (1,  H) or (TB, 1,  H) positional-encoding row(s)
    # o_ref : same shape as x_ref
    o_ref[...] = (x_ref[...] + pe_ref[...]).astype(o_ref.dtype)


# ---------------------------------------------------------------------------
# PE table (same math as the module's __init__)
# ---------------------------------------------------------------------------
def make_pe_table(max_position_embeddings: int,
                  hidden_size: int,
                  dtype=jnp.float32) -> jnp.ndarray:
    """Deterministic sin/cos table, shape (P, 1, H).

    Build it once in the activation dtype (e.g. bf16) and cache it so the
    forward path never pays an extra HBM pass for a dtype cast."""
    assert hidden_size % 2 == 0, "hidden_size must be even (sin/cos interleave)"
    P, H = max_position_embeddings, hidden_size
    position = jnp.arange(0, P, dtype=jnp.float32)[:, None]                    # (P, 1)
    div_term = jnp.power(10000.0,
                         -jnp.arange(0, H, 2, dtype=jnp.float32) / H)          # (H/2,)
    pe = jnp.zeros((P, H), dtype=jnp.float32)
    pe = pe.at[:, 0::2].set(jnp.sin(position * div_term))
    pe = pe.at[:, 1::2].set(jnp.cos(position * div_term))
    return pe[:, None, :].astype(dtype)                                        # (P, 1, H)


# ---------------------------------------------------------------------------
# Tiling helpers
# ---------------------------------------------------------------------------
def _row_cap_for_chip() -> int:
    """~512-row tiles already hit ~85% of HBM roofline; v7x (faster HBM per TC,
    64 MiB VMEM) prefers the upper end of the sweet spot."""
    try:
        info = pltpu.get_tpu_info()
        cap = int(getattr(info, "vmem_capacity_bytes", 0) or 0)
        if 0 < cap <= 64 * _MIB:       # v7x
            return 1024
    except Exception:
        pass
    return 512                          # v5e / v6e


def _row_align(itemsize: int) -> int:
    # packed-sublane multiple: 8 rows f32, 16 bf16, 32 int8/fp8
    return max(8, 32 // max(int(itemsize), 1))


def _pick_rows(total_rows: int, h: int, itemsize: int, row_cap: int) -> int:
    """Largest row tile <= row_cap (and roughly <= 2 MiB per buffer), aligned to
    the sublane-packing multiple, or the full extent when it already fits."""
    align = _row_align(itemsize)
    by_bytes = max(align, (2 * _MIB) // max(h * itemsize, 1))
    cap = max(align, min(row_cap, by_bytes))
    if total_rows <= cap:
        return total_rows               # full-extent block is always legal
    return max(align, (cap // align) * align)


# ---------------------------------------------------------------------------
# Forward
# ---------------------------------------------------------------------------
def absolute_positional_encoding(hidden_states: jnp.ndarray,
                                 pe: jnp.ndarray,
                                 *,
                                 donate_input: bool = True) -> jnp.ndarray:
    """hidden_states: (B, S, H); pe: (P, 1, H). Output dtype = hidden_states.dtype."""
    B, S, H = hidden_states.shape
    P, pe_seq, pe_h = pe.shape
    assert pe_seq == 1 and pe_h == H, "pe must have shape (P, 1, H)"
    assert B == P or B == 1 or P == 1, (
        "PyTorch broadcast (B,S,H)+(P,1,H) requires B == max_position_embeddings "
        "or one of them to be 1")

    dtype = hidden_states.dtype
    itemsize = jnp.dtype(dtype).itemsize

    # pe[:, :seq_len, :] is a no-op slice (dim 1 has size 1). Run the add at
    # activation precision; prefer caching the table in this dtype (see
    # make_pe_table) so this cast is a no-op on the hot path.
    if pe.dtype != dtype:
        pe = pe.astype(dtype)

    row_cap = _row_cap_for_chip()
    OB = max(B, P)

    if P == 1:
        # Single pe row broadcast over every (batch, position): flatten to a
        # 1-D row grid so per-step overhead stays amortized even for small S.
        rows = B * S
        x2d = hidden_states.reshape(rows, H)
        pe2d = pe.reshape(1, H)
        TR = _pick_rows(rows, H, itemsize, row_cap)
        grid = (pl.cdiv(rows, TR),)
        in_specs = [
            pl.BlockSpec((TR, H), lambda i: (i, 0)),
            pl.BlockSpec((1, H), lambda i: (0, 0)),   # resident across steps
        ]
        out_specs = pl.BlockSpec((TR, H), lambda i: (i, 0))
        out_shape = jax.ShapeDtypeStruct((rows, H), dtype)
        dim_sem = ("parallel",)
        args = (x2d, pe2d)
        tile_rows, pe_rows = TR, 1
        reshape_out = (B, S, H)
        alias = {0: 0} if donate_input else {}
    else:
        # (B,S,H) + (P,1,H): pe row is indexed by *batch* (PyTorch semantics).
        TS = _pick_rows(S, H, itemsize, row_cap)
        ns = pl.cdiv(S, TS)

        # Coarsen the batch axis when the whole sequence fits in one tile so a
        # large OB doesn't degenerate into many tiny sub-roofline grid steps.
        TB = 1
        if B == P and ns == 1:
            TB = max(1, min(OB,
                            row_cap // max(TS, 1),
                            (2 * _MIB) // max(TS * H * itemsize, 1)))

        grid = (pl.cdiv(OB, TB), ns)

        if TB == 1:
            x_bdim = pl.Squeezed()                    # kernel sees (TS, H)
            pe_block = (pl.Squeezed(), 1, H)
        else:
            x_bdim = TB                               # kernel sees (TB, TS, H)
            pe_block = (TB, 1, H)

        x_idx = (lambda b, s: (b, s, 0)) if B > 1 else (lambda b, s: (0, s, 0))
        pe_idx = lambda b, s: (b, 0, 0)               # constant along seq axis

        in_specs = [
            pl.BlockSpec((x_bdim, TS, H), x_idx),
            pl.BlockSpec(pe_block, pe_idx),
        ]
        out_specs = pl.BlockSpec((x_bdim, TS, H), lambda b, s: (b, s, 0))
        out_shape = jax.ShapeDtypeStruct((OB, S, H), dtype)
        dim_sem = ("parallel", "parallel")            # no cross-step carry
        args = (hidden_states, pe)
        tile_rows, pe_rows = TB * TS, TB
        reshape_out = None
        alias = {0: 0} if (donate_input and OB == B) else {}

    # VMEM limit = actual pipeline footprint (x/out double-buffered + pe) + slack.
    x_tile_bytes = tile_rows * H * itemsize
    pe_tile_bytes = pe_rows * H * itemsize
    footprint = 4 * x_tile_bytes + 2 * pe_tile_bytes
    vmem_limit = int(min(128 * _MIB, max(8 * _MIB, 2 * footprint)))

    cost = pl.CostEstimate(
        flops=OB * S * H,
        transcendentals=0,
        bytes_accessed=(2 * OB * S * H + P * H) * itemsize)

    out = pl.pallas_call(
        _add_pe_kernel,
        out_shape=out_shape,
        grid=grid,
        in_specs=in_specs,
        out_specs=out_specs,
        input_output_aliases=alias,
        compiler_params=pltpu.CompilerParams(
            dimension_semantics=dim_sem,
            vmem_limit_bytes=vmem_limit),
        cost_estimate=cost,
    )(*args)

    if reshape_out is not None:
        out = out.reshape(reshape_out)
    return out


# ---------------------------------------------------------------------------
# Demo / correctness check
# ---------------------------------------------------------------------------
if __name__ == "__main__":
    # Small shapes consistent with the module. batch == max_position_embeddings
    # so the module's (B,S,H)+(P,1,H) broadcast is well-formed and
    # shape-preserving; hidden_size is a multiple of 128 -> lane-dense stores.
    max_position_embeddings = 4
    hidden_size = 128
    batch = 4
    seq = 16

    key = jax.random.PRNGKey(0)
    hidden_states = jax.random.normal(key, (batch, seq, hidden_size),
                                      dtype=jnp.float32)

    # Case 1: P == B  (batched-grid path, batch-coarsened block)
    pe = make_pe_table(max_position_embeddings, hidden_size,
                       dtype=hidden_states.dtype)
    ref = hidden_states + pe[:, :seq, :]

    # Case 2: P == 1  (flattened 1-D row-grid path)
    pe1 = make_pe_table(1, hidden_size, dtype=hidden_states.dtype)
    ref1 = hidden_states + pe1[:, :seq, :]

    out = jax.block_until_ready(absolute_positional_encoding(hidden_states, pe))
    assert out.shape == ref.shape and out.dtype == ref.dtype
    assert jnp.allclose(out, ref, atol=1e-6), "mismatch vs reference (P == B)"

    out1 = jax.block_until_ready(absolute_positional_encoding(hidden_states, pe1))
    assert out1.shape == ref1.shape and out1.dtype == ref1.dtype
    assert jnp.allclose(out1, ref1, atol=1e-6), "mismatch vs reference (P == 1)"

    print("KERNEL_OK")
</pallas_src>

<mosaic_0001>
module attributes {stable_mosaic.version = 11 : i64} {
  func.func @_add_pe_kernel(%arg0: i32, %arg1: i32, %arg2: memref<4x16x128xf32, #tpu.memory_space<vmem>>, %arg3: memref<4x1x128xf32, #tpu.memory_space<vmem>>, %arg4: memref<4x16x128xf32, #tpu.memory_space<vmem>>) attributes {dimension_semantics = [#tpu.dimension_semantics<parallel>, #tpu.dimension_semantics<parallel>], iteration_bounds = array<i64: 1, 1>, scalar_prefetch = 0 : i64, scratch_operands = 0 : i64, tpu.core_type = #tpu.core_type<tc>, window_params = [{transform_indices = @transform_0, window_bounds = array<i64: 4, 16, 128>}, {transform_indices = @transform_1, window_bounds = array<i64: 4, 1, 128>}, {transform_indices = @transform_2, window_bounds = array<i64: 4, 16, 128>}]} {
    %c0 = arith.constant 0 : index
    %c0_0 = arith.constant 0 : index
    %c0_1 = arith.constant 0 : index
    %0 = vector.load %arg2[%c0, %c0_0, %c0_1] : memref<4x16x128xf32, #tpu.memory_space<vmem>>, vector<4x16x128xf32>
    %c0_2 = arith.constant 0 : index
    %c0_3 = arith.constant 0 : index
    %c0_4 = arith.constant 0 : index
    %1 = vector.load %arg3[%c0_2, %c0_3, %c0_4] : memref<4x1x128xf32, #tpu.memory_space<vmem>>, vector<4x1x128xf32>
    %2 = vector.broadcast %1 : vector<4x1x128xf32> to vector<4x16x128xf32>
    %3 = arith.addf %0, %2 : vector<4x16x128xf32>
    %c0_5 = arith.constant 0 : index
    %c0_6 = arith.constant 0 : index
    %c0_7 = arith.constant 0 : index
    %4 = vector.load %arg4[%c0_5, %c0_6, %c0_7] : memref<4x16x128xf32, #tpu.memory_space<vmem>>, vector<4x16x128xf32>
    tpu.vector_store %arg4[%c0_5, %c0_6, %c0_7], %3 {strides = array<i32>} : memref<4x16x128xf32, #tpu.memory_space<vmem>>, vector<4x16x128xf32>,
    return
  }
  func.func @transform_0(%arg0: i32, %arg1: i32) -> (i32, i32, i32) {
    %c0_i32 = arith.constant 0 : i32
    %c0_i32_0 = arith.constant 0 : i32
    return %arg0, %arg1, %c0_i32 : i32, i32, i32
  }
  func.func @transform_1(%arg0: i32, %arg1: i32) -> (i32, i32, i32) {
    %c0_i32 = arith.constant 0 : i32
    %c0_i32_0 = arith.constant 0 : i32
    %c0_i32_1 = arith.constant 0 : i32
    return %arg0, %c0_i32, %c0_i32_0 : i32, i32, i32
  }
  func.func @transform_2(%arg0: i32, %arg1: i32) -> (i32, i32, i32) {
    %c0_i32 = arith.constant 0 : i32
    %c0_i32_0 = arith.constant 0 : i32
    return %arg0, %arg1, %c0_i32 : i32, i32, i32
  }
}

</mosaic_0001>

<bundles_post_ra>
// kernel: tpu_custom_call.1
= control target key start
LH: loop header
LB: loop body
LE: loop exit
PB: predicated region body
PF: predicated region fallthrough
CT: control target
= control target key end

     0   :  { %7 = vsyncpa [#allocation3], 0  ;;  %s212_s0 = inlined_call_operand.hbm [shape: f32[4,16,128], index: 0, kind: input, shape index: {}, may-alias: {0,2}]   ;;  %s213_s1 = inlined_call_operand.vmem [shape: f32[4,1,128], index: 1, kind: input, shape index: {}]   ;;  %s214_s2 = inlined_call_operand.hbm [shape: f32[4,16,128], index: 2, kind: output, shape index: {}, may-alias: {0,2}]  }
   0x1   :  { %8 = vsyncpa [#allocation4], 0  ;;  %s151_s9 = smov [#allocation2]   ;;  %s103_s13 = scalar_lea.hbm %s212_s0, 1024 }
   0x2   :  { %s14_s10 = sshll.u32 %s151_s9, 4  ;;  %p104_p0 = scmp.ne.s32.totalorder %s212_s0, %s103_s13  ;;  %s15_s10 = int_to_ptr.vmem [resolvable:$true] %s14_s10 }
   0x3   :  { %p107_p1 = scmp.lt.u32.totalorder %s103_s13, %s212_s0 }
   0x5   :  { %p109_p2 = pnand %p107_p1, %p104_p0 }
   0x7   :  { %112 = shalt.err (!%p109_p2)
}
   0x8   :  { %s113_s18 = scalar_lea.vmem %s15_s10, 1024  ;;  %p118_p4 = scmp.lt.s32.totalorder %s15_s10, %s15_s10 }
   0x9   :  { %p114_p3 = scmp.ne.s32.totalorder %s15_s10, %s113_s18  ;;  %p119_p5 = scmp.lt.s32.totalorder %s113_s18, %s113_s18 }
   0xb   :  { %p120_p6 = por %p119_p5, %p118_p4 }
   0xd   :  { %p121_p7 = pnand %p120_p6, %p114_p3 }
   0xf   :  { %124 = shalt.err (!%p121_p7)
}
  0x10   :  { %s152_s19 = smov 128   ;;  %s153_s20 = smov 8  }
  0x11   :  { %20 = dma.hbm_to_vmem [thread:$0]  %s212_s0, 1024, %s15_s10, [#allocation3], %s152_s19, %s152_s19, %s153_s20  }
  0x12   :  { %147 = dma.done.wait [#allocation3], 1024  }
  0x13   :  { %148 = vsyncadd [#allocation3], 4294966272  ;;  %v26_v0 = vld [vmem:[#allocation2] sm:$0xff]  ;;  %v27_v2 = vld [vmem:[#allocation2 + $0x8] sm:$0xff]  ;;  %s154_s27 = smov [#allocation5]  }
  0x14   :  { %v95_v1 = vld [vmem:[%s213_s1] ss:$0 sm:$0xff]  ;;  %v28_v5 = vld [vmem:[#allocation2 + $0x10] sm:$0xff]  ;;  %v96_v6 = vld [vmem:[%s213_s1 + $0x1] ss:$0 sm:$0xff]  ;;  %s83_s28 = sshll.u32 %s154_s27, 4  ;;  %s84_s28 = int_to_ptr.vmem [resolvable:$true] %s83_s28 }
  0x15   :  { %v62_v3 = vadd.f32 %v95_v1, %v26_v0  ;;  %v63_v4 = vadd.f32 %v95_v1, %v27_v2  ;;  %v29_v7 = vld [vmem:[#allocation2 + $0x18] sm:$0xff]  ;;  %v64_v8 = vadd.f32 %v96_v6, %v28_v5  ;;  %v30_v10 = vld [vmem:[#allocation2 + $0x20] sm:$0xff]  ;;  %v31_v12 = vld [vmem:[#allocation2 + $0x28] sm:$0xff]  ;;  %s125_s4 = scalar_lea.vmem %s84_s28, 1024  ;;  %p130_p9 = scmp.lt.s32.totalorder %s84_s28, %s84_s28 }
  0x16   :  { %v65_v9 = vadd.f32 %v96_v6, %v29_v7  ;;  %v97_v11 = vld [vmem:[%s213_s1 + $0x2] ss:$0 sm:$0xff]  ;;  %v32_v15 = vld [vmem:[#allocation2 + $0x30] sm:$0xff]  ;;  %v98_v16 = vld [vmem:[%s213_s1 + $0x3] ss:$0 sm:$0xff]  ;;  %p126_p8 = scmp.ne.s32.totalorder %s84_s28, %s125_s4  ;;  %p131_p10 = scmp.lt.s32.totalorder %s125_s4, %s125_s4 }
  0x17   :  { %70 = vst [vmem:[#allocation5] sm:$0xff] %v62_v3  ;;  %71 = vst [vmem:[#allocation5 + $0x8] sm:$0xff] %v63_v4  ;;  %v66_v13 = vadd.f32 %v97_v11, %v30_v10  ;;  %v67_v14 = vadd.f32 %v97_v11, %v31_v12  ;;  %v33_v17 = vld [vmem:[#allocation2 + $0x38] sm:$0xff]  ;;  %v68_v18 = vadd.f32 %v98_v16, %v32_v15 }
  0x18   :  { %72 = vst [vmem:[#allocation5 + $0x10] sm:$0xff] %v64_v8  ;;  %73 = vst [vmem:[#allocation5 + $0x18] sm:$0xff] %v65_v9  ;;  %v69_v19 = vadd.f32 %v98_v16, %v33_v17  ;;  %p132_p11 = por %p131_p10, %p130_p9 }
  0x19   :  { %74 = vst [vmem:[#allocation5 + $0x20] sm:$0xff] %v66_v13  ;;  %75 = vst [vmem:[#allocation5 + $0x28] sm:$0xff] %v67_v14 }
  0x1a   :  { %76 = vst [vmem:[#allocation5 + $0x30] sm:$0xff] %v68_v18  ;;  %77 = vst [vmem:[#allocation5 + $0x38] sm:$0xff] %v69_v19  ;;  %p133_p12 = pnand %p132_p11, %p126_p8 }
  0x1c   :  { %136 = shalt.err (!%p133_p12)
}
  0x1d   :  { %s137_s1 = scalar_lea.hbm %s214_s2, 1024 }
  0x1e   :  { %p138_p13 = scmp.ne.s32.totalorder %s214_s2, %s137_s1  ;;  %p141_p0 = scmp.lt.u32.totalorder %s137_s1, %s214_s2 }
  0x20   :  { %p143_p1 = pnand %p141_p0, %p138_p13 }
  0x22   :  { %146 = shalt.err (!%p143_p1)
}
  0x23   :  { %89 = dma.vmem_to_hbm [thread:$0]  %s84_s28, 1024, %s214_s2, [#allocation4], %s152_s19, %s152_s19, %s153_s20  }
  0x24   :  { %149 = dma.done.wait [#allocation4], 1024  }
  0x25   :  { %150 = vsyncadd [#allocation4], 4294966272 }
  0x26   :  { %93 = vsyncpa [#allocation3], 1 }
  0x27   :  { %94 = vsyncpa [#allocation4], 1 }

</bundles_post_ra>
